<compile_context>
chip_gen: v5e
topology: v5e:2x2
jax: 0.10.0
libtpu: 0.0.40
codegen_flags: <defaults>
</compile_context>

<pallas_src>
import functools
import math

import jax
import jax.numpy as jnp
from jax.experimental import pallas as pl
from jax.experimental.pallas import tpu as pltpu

# ---------------- model hyper-parameters ----------------
D_MODEL = 32
D_K = 8
D_V = 8
N_HEADS = 4
BATCH = 2
SEQ = 8
LN_EPS = 1e-5


# ---------------- fused forward kernel ----------------
def _fused_mha_kernel(x_ref, mask_ref, wqkv_ref, bqkv_ref, wo_ref, bo_ref,
                      gamma_ref, beta_ref, out_ref, attn_ref, ctx_ref,
                      *, batch, seq, n_heads, d_k, d_v, scale, eps):
    bs = batch * seq
    hk = n_heads * d_k
    hv = n_heads * d_v

    x = x_ref[...]                                    # (3*B*S, D): rows = [Q ; K ; V]

    # --- fused Q/K/V projection: one wide MXU pass ---------------------------
    # wqkv columns are [W_Q | W_K | W_V]; keep only the matching
    # (input-stream rows, weight-block cols) slices of the (3*B*S, 96) product.
    proj = jnp.dot(x, wqkv_ref[...], preferred_element_type=jnp.float32)
    bqkv = bqkv_ref[...]                              # (1, 2*H*d_k + H*d_v)

    q = proj[0 * bs:1 * bs, 0 * hk:1 * hk] + bqkv[:, 0 * hk:1 * hk]        # (B*S, H*d_k)
    k = proj[1 * bs:2 * bs, 1 * hk:2 * hk] + bqkv[:, 1 * hk:2 * hk]        # (B*S, H*d_k)
    v = proj[2 * bs:3 * bs, 2 * hk:2 * hk + hv] + bqkv[:, 2 * hk:2 * hk + hv]  # (B*S, H*d_v)

    # --- scaled dot-product attention (fully unrolled, all VMEM-resident) ----
    for b in range(batch):
        mask_b = mask_ref[b]                          # (S, S) int32, nonzero == masked
        r0, r1 = b * seq, (b + 1) * seq
        for h in range(n_heads):
            q_bh = q[r0:r1, h * d_k:(h + 1) * d_k]    # (S, d_k)
            k_bh = k[r0:r1, h * d_k:(h + 1) * d_k]    # (S, d_k)
            v_bh = v[r0:r1, h * d_v:(h + 1) * d_v]    # (S, d_v)

            scores = jnp.dot(q_bh, k_bh.T, preferred_element_type=jnp.float32) * scale
            scores = jnp.where(mask_b != 0, jnp.float32(-1e9), scores)

            m = jnp.max(scores, axis=-1, keepdims=True)
            p = jnp.exp(scores - m)
            probs = p / jnp.sum(p, axis=-1, keepdims=True)    # (S, S)

            attn_ref[b, h] = probs.astype(attn_ref.dtype)
            ctx_ref[r0:r1, h * d_v:(h + 1) * d_v] = jnp.dot(
                probs, v_bh, preferred_element_type=jnp.float32)

    # --- output projection + residual + LayerNorm ----------------------------
    ctx = ctx_ref[...]                                # (B*S, H*d_v), lane width 32
    out = jnp.dot(ctx, wo_ref[...], preferred_element_type=jnp.float32) + bo_ref[...]
    y = out + x[0:bs, :]                              # residual = original Q rows

    mean = jnp.mean(y, axis=-1, keepdims=True)
    yc = y - mean
    var = jnp.mean(yc * yc, axis=-1, keepdims=True)   # biased variance (torch LayerNorm)
    inv = jax.lax.rsqrt(var + eps)
    out_ref[...] = (yc * inv * gamma_ref[...] + beta_ref[...]).astype(out_ref.dtype)


def multi_head_attention(params, Q, K, V, attn_mask):
    B, S, D = Q.shape
    # Stack the three input streams row-wise so the kernel does one projection matmul.
    x = jnp.concatenate(
        [Q.reshape(B * S, D), K.reshape(B * S, D), V.reshape(B * S, D)], axis=0)

    kernel = functools.partial(
        _fused_mha_kernel, batch=B, seq=S, n_heads=N_HEADS, d_k=D_K, d_v=D_V,
        scale=1.0 / math.sqrt(D_K), eps=LN_EPS)

    out2, attn = pl.pallas_call(
        kernel,
        out_shape=(
            jax.ShapeDtypeStruct((B * S, D), jnp.float32),
            jax.ShapeDtypeStruct((B, N_HEADS, S, S), jnp.float32),
        ),
        scratch_shapes=[pltpu.VMEM((B * S, N_HEADS * D_V), jnp.float32)],
    )(x, attn_mask, params["W_QKV"], params["b_QKV"],
      params["W_O"], params["b_O"], params["ln_gamma"], params["ln_beta"])

    return out2.reshape(B, S, D), attn


# ---------------- parameter init (deterministic, synthetic) ----------------
def init_params(key):
    ks = jax.random.split(key, 8)

    def lin(kw, kb, fan_in, fan_out):
        bound = 1.0 / math.sqrt(fan_in)
        w = jax.random.uniform(kw, (fan_in, fan_out), jnp.float32, -bound, bound)
        b = jax.random.uniform(kb, (fan_out,), jnp.float32, -bound, bound)
        return w, b

    w_q, b_q = lin(ks[0], ks[1], D_MODEL, D_K * N_HEADS)
    w_k, b_k = lin(ks[2], ks[3], D_MODEL, D_K * N_HEADS)
    w_v, b_v = lin(ks[4], ks[5], D_MODEL, D_V * N_HEADS)
    # note: in the PyTorch reference W_O / LayerNorm are created fresh inside
    # forward(); here they are deterministic synthetic parameters.
    w_o, b_o = lin(ks[6], ks[7], N_HEADS * D_V, D_MODEL)

    return {
        # fused projection weight: columns = [W_Q | W_K | W_V]
        "W_QKV": jnp.concatenate([w_q, w_k, w_v], axis=1),
        "b_QKV": jnp.concatenate([b_q, b_k, b_v]).reshape(1, -1),
        "W_O": w_o,
        "b_O": b_o.reshape(1, D_MODEL),
        "ln_gamma": jnp.ones((1, D_MODEL), jnp.float32),
        "ln_beta": jnp.zeros((1, D_MODEL), jnp.float32),
    }


# ---------------- demo ----------------
if __name__ == "__main__":
    key = jax.random.PRNGKey(0)
    k_param, k_q, k_k, k_v = jax.random.split(key, 4)

    params = init_params(k_param)

    Q = jax.random.normal(k_q, (BATCH, SEQ, D_MODEL), jnp.float32)
    K = jax.random.normal(k_k, (BATCH, SEQ, D_MODEL), jnp.float32)
    V = jax.random.normal(k_v, (BATCH, SEQ, D_MODEL), jnp.float32)

    # padding mask: last 2 key positions of batch element 1 are padded (1 = masked)
    attn_mask = jnp.zeros((BATCH, SEQ, SEQ), jnp.int32)
    attn_mask = attn_mask.at[1, :, SEQ - 2:].set(1)

    out, attn = multi_head_attention(params, Q, K, V, attn_mask)
    out = jax.block_until_ready(out)
    attn = jax.block_until_ready(attn)

    assert out.shape == (BATCH, SEQ, D_MODEL)
    assert attn.shape == (BATCH, N_HEADS, SEQ, SEQ)
    assert bool(jnp.all(jnp.isfinite(out)))
    # softmax rows sum to 1
    assert bool(jnp.allclose(jnp.sum(attn, axis=-1), 1.0, atol=1e-5))
    # masked key columns get ~0 probability
    assert bool(jnp.all(attn[1, :, :, SEQ - 2:] < 1e-6))

    print("KERNEL_OK")
</pallas_src>

<mosaic_0001>
module attributes {stable_mosaic.version = 11 : i64} {
  func.func @_fused_mha_kernel(%arg0: memref<48x32xf32, #tpu.memory_space<vmem>>, %arg1: memref<2x8x8xi32, #tpu.memory_space<vmem>>, %arg2: memref<32x96xf32, #tpu.memory_space<vmem>>, %arg3: memref<1x96xf32, #tpu.memory_space<vmem>>, %arg4: memref<32x32xf32, #tpu.memory_space<vmem>>, %arg5: memref<1x32xf32, #tpu.memory_space<vmem>>, %arg6: memref<1x32xf32, #tpu.memory_space<vmem>>, %arg7: memref<1x32xf32, #tpu.memory_space<vmem>>, %arg8: memref<16x32xf32, #tpu.memory_space<vmem>>, %arg9: memref<2x4x8x8xf32, #tpu.memory_space<vmem>>, %arg10: memref<16x32xf32, #tpu.memory_space<vmem>>) attributes {dimension_semantics = [], scalar_prefetch = 0 : i64, scratch_operands = 1 : i64, tpu.core_type = #tpu.core_type<tc>} {
    %c0 = arith.constant 0 : index
    %c0_0 = arith.constant 0 : index
    %0 = vector.load %arg0[%c0, %c0_0] : memref<48x32xf32, #tpu.memory_space<vmem>>, vector<48x32xf32>
    %c0_1 = arith.constant 0 : index
    %c0_2 = arith.constant 0 : index
    %1 = vector.load %arg2[%c0_1, %c0_2] : memref<32x96xf32, #tpu.memory_space<vmem>>, vector<32x96xf32>
    %cst = arith.constant dense<0.000000e+00> : vector<48x96xf32>
    %2 = tpu.matmul %0, %1, %cst {dimension_numbers = #tpu.dot_dimension_numbers<[1], [0], [0], [1], [0, 0, 1, 1], [], []>} : vector<48x32xf32>, vector<32x96xf32>, vector<48x96xf32> -> vector<48x96xf32>
    %c0_3 = arith.constant 0 : index
    %c0_4 = arith.constant 0 : index
    %3 = vector.load %arg3[%c0_3, %c0_4] : memref<1x96xf32, #tpu.memory_space<vmem>>, vector<1x96xf32>
    %4 = vector.extract_strided_slice %2 {offsets = [0, 0], sizes = [16, 32], strides = [1, 1]} : vector<48x96xf32> to vector<16x32xf32>
    %5 = vector.extract_strided_slice %3 {offsets = [0, 0], sizes = [1, 32], strides = [1, 1]} : vector<1x96xf32> to vector<1x32xf32>
    %6 = vector.broadcast %5 : vector<1x32xf32> to vector<16x32xf32>
    %7 = arith.addf %4, %6 : vector<16x32xf32>
    %8 = vector.extract_strided_slice %2 {offsets = [16, 32], sizes = [16, 32], strides = [1, 1]} : vector<48x96xf32> to vector<16x32xf32>
    %9 = vector.extract_strided_slice %3 {offsets = [0, 32], sizes = [1, 32], strides = [1, 1]} : vector<1x96xf32> to vector<1x32xf32>
    %10 = vector.broadcast %9 : vector<1x32xf32> to vector<16x32xf32>
    %11 = arith.addf %8, %10 : vector<16x32xf32>
    %12 = vector.extract_strided_slice %2 {offsets = [32, 64], sizes = [16, 32], strides = [1, 1]} : vector<48x96xf32> to vector<16x32xf32>
    %13 = vector.extract_strided_slice %3 {offsets = [0, 64], sizes = [1, 32], strides = [1, 1]} : vector<1x96xf32> to vector<1x32xf32>
    %14 = vector.broadcast %13 : vector<1x32xf32> to vector<16x32xf32>
    %15 = arith.addf %12, %14 : vector<16x32xf32>
    %c0_5 = arith.constant 0 : index
    %c0_6 = arith.constant 0 : index
    %c0_7 = arith.constant 0 : index
    %16 = vector.load %arg1[%c0_5, %c0_6, %c0_7] : memref<2x8x8xi32, #tpu.memory_space<vmem>>, vector<1x8x8xi32>
    %17 = vector.shape_cast %16 : vector<1x8x8xi32> to vector<8x8xi32>
    %18 = vector.extract_strided_slice %7 {offsets = [0, 0], sizes = [8, 8], strides = [1, 1]} : vector<16x32xf32> to vector<8x8xf32>
    %19 = vector.extract_strided_slice %11 {offsets = [0, 0], sizes = [8, 8], strides = [1, 1]} : vector<16x32xf32> to vector<8x8xf32>
    %20 = vector.extract_strided_slice %15 {offsets = [0, 0], sizes = [8, 8], strides = [1, 1]} : vector<16x32xf32> to vector<8x8xf32>
    %21 = tpu.transpose %19, [1, 0] : vector<8x8xf32> -> vector<8x8xf32>
    %cst_8 = arith.constant dense<0.000000e+00> : vector<8x8xf32>
    %22 = tpu.matmul %18, %21, %cst_8 {dimension_numbers = #tpu.dot_dimension_numbers<[1], [0], [0], [1], [0, 0, 1, 1], [], []>} : vector<8x8xf32>, vector<8x8xf32>, vector<8x8xf32> -> vector<8x8xf32>
    %cst_9 = arith.constant 0.353553385 : f32
    %23 = vector.broadcast %cst_9 : f32 to vector<8x8xf32>
    %24 = arith.mulf %22, %23 : vector<8x8xf32>
    %c0_i32 = arith.constant 0 : i32
    %25 = vector.broadcast %c0_i32 : i32 to vector<8x8xi32>
    %26 = arith.cmpi ne, %17, %25 : vector<8x8xi32>
    %cst_10 = arith.constant -1.000000e+09 : f32
    %27 = vector.broadcast %cst_10 : f32 to vector<8x8xf32>
    %28 = arith.select %26, %27, %24 : vector<8x8xi1>, vector<8x8xf32>
    %cst_11 = arith.constant dense<0xFF800000> : vector<8xf32>
    %29 = vector.multi_reduction <maximumf>, %28, %cst_11 [1] : vector<8x8xf32> to vector<8xf32>
    %30 = vector.shape_cast %29 : vector<8xf32> to vector<8x1xf32>
    %31 = vector.broadcast %30 : vector<8x1xf32> to vector<8x8xf32>
    %32 = arith.subf %28, %31 : vector<8x8xf32>
    %33 = math.exp %32 : vector<8x8xf32>
    %cst_12 = arith.constant dense<0.000000e+00> : vector<8xf32>
    %34 = vector.multi_reduction <add>, %33, %cst_12 [1] : vector<8x8xf32> to vector<8xf32>
    %35 = vector.shape_cast %34 : vector<8xf32> to vector<8x1xf32>
    %36 = vector.broadcast %35 : vector<8x1xf32> to vector<8x8xf32>
    %37 = arith.divf %33, %36 : vector<8x8xf32>
    %c0_13 = arith.constant 0 : index
    %c0_14 = arith.constant 0 : index
    %c0_15 = arith.constant 0 : index
    %c0_16 = arith.constant 0 : index
    %38 = vector.load %arg9[%c0_13, %c0_14, %c0_15, %c0_16] : memref<2x4x8x8xf32, #tpu.memory_space<vmem>>, vector<1x1x8x8xf32>
    %39 = vector.shape_cast %38 : vector<1x1x8x8xf32> to vector<8x8xf32>
    %40 = vector.shape_cast %37 : vector<8x8xf32> to vector<1x1x8x8xf32>
    tpu.vector_store %arg9[%c0_13, %c0_14, %c0_15, %c0_16], %40 {strides = array<i32>} : memref<2x4x8x8xf32, #tpu.memory_space<vmem>>, vector<1x1x8x8xf32>,
    %cst_17 = arith.constant dense<0.000000e+00> : vector<8x8xf32>
    %41 = tpu.matmul %37, %20, %cst_17 {dimension_numbers = #tpu.dot_dimension_numbers<[1], [0], [0], [1], [0, 0, 1, 1], [], []>} : vector<8x8xf32>, vector<8x8xf32>, vector<8x8xf32> -> vector<8x8xf32>
    %c0_18 = arith.constant 0 : index
    %c0_19 = arith.constant 0 : index
    %42 = vector.load %arg10[%c0_18, %c0_19] : memref<16x32xf32, #tpu.memory_space<vmem>>, vector<8x8xf32>
    tpu.vector_store %arg10[%c0_18, %c0_19], %41 {strides = array<i32>} : memref<16x32xf32, #tpu.memory_space<vmem>>, vector<8x8xf32>,
    %43 = vector.extract_strided_slice %7 {offsets = [0, 8], sizes = [8, 8], strides = [1, 1]} : vector<16x32xf32> to vector<8x8xf32>
    %44 = vector.extract_strided_slice %11 {offsets = [0, 8], sizes = [8, 8], strides = [1, 1]} : vector<16x32xf32> to vector<8x8xf32>
    %45 = vector.extract_strided_slice %15 {offsets = [0, 8], sizes = [8, 8], strides = [1, 1]} : vector<16x32xf32> to vector<8x8xf32>
    %46 = tpu.transpose %44, [1, 0] : vector<8x8xf32> -> vector<8x8xf32>
    %cst_20 = arith.constant dense<0.000000e+00> : vector<8x8xf32>
    %47 = tpu.matmul %43, %46, %cst_20 {dimension_numbers = #tpu.dot_dimension_numbers<[1], [0], [0], [1], [0, 0, 1, 1], [], []>} : vector<8x8xf32>, vector<8x8xf32>, vector<8x8xf32> -> vector<8x8xf32>
    %cst_21 = arith.constant 0.353553385 : f32
    %48 = vector.broadcast %cst_21 : f32 to vector<8x8xf32>
    %49 = arith.mulf %47, %48 : vector<8x8xf32>
    %c0_i32_22 = arith.constant 0 : i32
    %50 = vector.broadcast %c0_i32_22 : i32 to vector<8x8xi32>
    %51 = arith.cmpi ne, %17, %50 : vector<8x8xi32>
    %cst_23 = arith.constant -1.000000e+09 : f32
    %52 = vector.broadcast %cst_23 : f32 to vector<8x8xf32>
    %53 = arith.select %51, %52, %49 : vector<8x8xi1>, vector<8x8xf32>
    %cst_24 = arith.constant dense<0xFF800000> : vector<8xf32>
    %54 = vector.multi_reduction <maximumf>, %53, %cst_24 [1] : vector<8x8xf32> to vector<8xf32>
    %55 = vector.shape_cast %54 : vector<8xf32> to vector<8x1xf32>
    %56 = vector.broadcast %55 : vector<8x1xf32> to vector<8x8xf32>
    %57 = arith.subf %53, %56 : vector<8x8xf32>
    %58 = math.exp %57 : vector<8x8xf32>
    %cst_25 = arith.constant dense<0.000000e+00> : vector<8xf32>
    %59 = vector.multi_reduction <add>, %58, %cst_25 [1] : vector<8x8xf32> to vector<8xf32>
    %60 = vector.shape_cast %59 : vector<8xf32> to vector<8x1xf32>
    %61 = vector.broadcast %60 : vector<8x1xf32> to vector<8x8xf32>
    %62 = arith.divf %58, %61 : vector<8x8xf32>
    %c0_26 = arith.constant 0 : index
    %c1 = arith.constant 1 : index
    %c0_27 = arith.constant 0 : index
    %c0_28 = arith.constant 0 : index
    %63 = vector.load %arg9[%c0_26, %c1, %c0_27, %c0_28] : memref<2x4x8x8xf32, #tpu.memory_space<vmem>>, vector<1x1x8x8xf32>
    %64 = vector.shape_cast %63 : vector<1x1x8x8xf32> to vector<8x8xf32>
    %65 = vector.shape_cast %62 : vector<8x8xf32> to vector<1x1x8x8xf32>
    tpu.vector_store %arg9[%c0_26, %c1, %c0_27, %c0_28], %65 {strides = array<i32>} : memref<2x4x8x8xf32, #tpu.memory_space<vmem>>, vector<1x1x8x8xf32>,
    %cst_29 = arith.constant dense<0.000000e+00> : vector<8x8xf32>
    %66 = tpu.matmul %62, %45, %cst_29 {dimension_numbers = #tpu.dot_dimension_numbers<[1], [0], [0], [1], [0, 0, 1, 1], [], []>} : vector<8x8xf32>, vector<8x8xf32>, vector<8x8xf32> -> vector<8x8xf32>
    %c0_30 = arith.constant 0 : index
    %c8 = arith.constant 8 : index
    %67 = vector.load %arg10[%c0_30, %c8] : memref<16x32xf32, #tpu.memory_space<vmem>>, vector<8x8xf32>
    tpu.vector_store %arg10[%c0_30, %c8], %66 {strides = array<i32>} : memref<16x32xf32, #tpu.memory_space<vmem>>, vector<8x8xf32>,
    %68 = vector.extract_strided_slice %7 {offsets = [0, 16], sizes = [8, 8], strides = [1, 1]} : vector<16x32xf32> to vector<8x8xf32>
    %69 = vector.extract_strided_slice %11 {offsets = [0, 16], sizes = [8, 8], strides = [1, 1]} : vector<16x32xf32> to vector<8x8xf32>
    %70 = vector.extract_strided_slice %15 {offsets = [0, 16], sizes = [8, 8], strides = [1, 1]} : vector<16x32xf32> to vector<8x8xf32>
    %71 = tpu.transpose %69, [1, 0] : vector<8x8xf32> -> vector<8x8xf32>
    %cst_31 = arith.constant dense<0.000000e+00> : vector<8x8xf32>
    %72 = tpu.matmul %68, %71, %cst_31 {dimension_numbers = #tpu.dot_dimension_numbers<[1], [0], [0], [1], [0, 0, 1, 1], [], []>} : vector<8x8xf32>, vector<8x8xf32>, vector<8x8xf32> -> vector<8x8xf32>
    %cst_32 = arith.constant 0.353553385 : f32
    %73 = vector.broadcast %cst_32 : f32 to vector<8x8xf32>
    %74 = arith.mulf %72, %73 : vector<8x8xf32>
    %c0_i32_33 = arith.constant 0 : i32
    %75 = vector.broadcast %c0_i32_33 : i32 to vector<8x8xi32>
    %76 = arith.cmpi ne, %17, %75 : vector<8x8xi32>
    %cst_34 = arith.constant -1.000000e+09 : f32
    %77 = vector.broadcast %cst_34 : f32 to vector<8x8xf32>
    %78 = arith.select %76, %77, %74 : vector<8x8xi1>, vector<8x8xf32>
    %cst_35 = arith.constant dense<0xFF800000> : vector<8xf32>
    %79 = vector.multi_reduction <maximumf>, %78, %cst_35 [1] : vector<8x8xf32> to vector<8xf32>
    %80 = vector.shape_cast %79 : vector<8xf32> to vector<8x1xf32>
    %81 = vector.broadcast %80 : vector<8x1xf32> to vector<8x8xf32>
    %82 = arith.subf %78, %81 : vector<8x8xf32>
    %83 = math.exp %82 : vector<8x8xf32>
    %cst_36 = arith.constant dense<0.000000e+00> : vector<8xf32>
    %84 = vector.multi_reduction <add>, %83, %cst_36 [1] : vector<8x8xf32> to vector<8xf32>
    %85 = vector.shape_cast %84 : vector<8xf32> to vector<8x1xf32>
    %86 = vector.broadcast %85 : vector<8x1xf32> to vector<8x8xf32>
    %87 = arith.divf %83, %86 : vector<8x8xf32>
    %c0_37 = arith.constant 0 : index
    %c2 = arith.constant 2 : index
    %c0_38 = arith.constant 0 : index
    %c0_39 = arith.constant 0 : index
    %88 = vector.load %arg9[%c0_37, %c2, %c0_38, %c0_39] : memref<2x4x8x8xf32, #tpu.memory_space<vmem>>, vector<1x1x8x8xf32>
    %89 = vector.shape_cast %88 : vector<1x1x8x8xf32> to vector<8x8xf32>
    %90 = vector.shape_cast %87 : vector<8x8xf32> to vector<1x1x8x8xf32>
    tpu.vector_store %arg9[%c0_37, %c2, %c0_38, %c0_39], %90 {strides = array<i32>} : memref<2x4x8x8xf32, #tpu.memory_space<vmem>>, vector<1x1x8x8xf32>,
    %cst_40 = arith.constant dense<0.000000e+00> : vector<8x8xf32>
    %91 = tpu.matmul %87, %70, %cst_40 {dimension_numbers = #tpu.dot_dimension_numbers<[1], [0], [0], [1], [0, 0, 1, 1], [], []>} : vector<8x8xf32>, vector<8x8xf32>, vector<8x8xf32> -> vector<8x8xf32>
    %c0_41 = arith.constant 0 : index
    %c16 = arith.constant 16 : index
    %92 = vector.load %arg10[%c0_41, %c16] : memref<16x32xf32, #tpu.memory_space<vmem>>, vector<8x8xf32>
    tpu.vector_store %arg10[%c0_41, %c16], %91 {strides = array<i32>} : memref<16x32xf32, #tpu.memory_space<vmem>>, vector<8x8xf32>,
    %93 = vector.extract_strided_slice %7 {offsets = [0, 24], sizes = [8, 8], strides = [1, 1]} : vector<16x32xf32> to vector<8x8xf32>
    %94 = vector.extract_strided_slice %11 {offsets = [0, 24], sizes = [8, 8], strides = [1, 1]} : vector<16x32xf32> to vector<8x8xf32>
    %95 = vector.extract_strided_slice %15 {offsets = [0, 24], sizes = [8, 8], strides = [1, 1]} : vector<16x32xf32> to vector<8x8xf32>
    %96 = tpu.transpose %94, [1, 0] : vector<8x8xf32> -> vector<8x8xf32>
    %cst_42 = arith.constant dense<0.000000e+00> : vector<8x8xf32>
    %97 = tpu.matmul %93, %96, %cst_42 {dimension_numbers = #tpu.dot_dimension_numbers<[1], [0], [0], [1], [0, 0, 1, 1], [], []>} : vector<8x8xf32>, vector<8x8xf32>, vector<8x8xf32> -> vector<8x8xf32>
    %cst_43 = arith.constant 0.353553385 : f32
    %98 = vector.broadcast %cst_43 : f32 to vector<8x8xf32>
    %99 = arith.mulf %97, %98 : vector<8x8xf32>
    %c0_i32_44 = arith.constant 0 : i32
    %100 = vector.broadcast %c0_i32_44 : i32 to vector<8x8xi32>
    %101 = arith.cmpi ne, %17, %100 : vector<8x8xi32>
    %cst_45 = arith.constant -1.000000e+09 : f32
    %102 = vector.broadcast %cst_45 : f32 to vector<8x8xf32>
    %103 = arith.select %101, %102, %99 : vector<8x8xi1>, vector<8x8xf32>
    %cst_46 = arith.constant dense<0xFF800000> : vector<8xf32>
    %104 = vector.multi_reduction <maximumf>, %103, %cst_46 [1] : vector<8x8xf32> to vector<8xf32>
    %105 = vector.shape_cast %104 : vector<8xf32> to vector<8x1xf32>
    %106 = vector.broadcast %105 : vector<8x1xf32> to vector<8x8xf32>
    %107 = arith.subf %103, %106 : vector<8x8xf32>
    %108 = math.exp %107 : vector<8x8xf32>
    %cst_47 = arith.constant dense<0.000000e+00> : vector<8xf32>
    %109 = vector.multi_reduction <add>, %108, %cst_47 [1] : vector<8x8xf32> to vector<8xf32>
    %110 = vector.shape_cast %109 : vector<8xf32> to vector<8x1xf32>
    %111 = vector.broadcast %110 : vector<8x1xf32> to vector<8x8xf32>
    %112 = arith.divf %108, %111 : vector<8x8xf32>
    %c0_48 = arith.constant 0 : index
    %c3 = arith.constant 3 : index
    %c0_49 = arith.constant 0 : index
    %c0_50 = arith.constant 0 : index
    %113 = vector.load %arg9[%c0_48, %c3, %c0_49, %c0_50] : memref<2x4x8x8xf32, #tpu.memory_space<vmem>>, vector<1x1x8x8xf32>
    %114 = vector.shape_cast %113 : vector<1x1x8x8xf32> to vector<8x8xf32>
    %115 = vector.shape_cast %112 : vector<8x8xf32> to vector<1x1x8x8xf32>
    tpu.vector_store %arg9[%c0_48, %c3, %c0_49, %c0_50], %115 {strides = array<i32>} : memref<2x4x8x8xf32, #tpu.memory_space<vmem>>, vector<1x1x8x8xf32>,
    %cst_51 = arith.constant dense<0.000000e+00> : vector<8x8xf32>
    %116 = tpu.matmul %112, %95, %cst_51 {dimension_numbers = #tpu.dot_dimension_numbers<[1], [0], [0], [1], [0, 0, 1, 1], [], []>} : vector<8x8xf32>, vector<8x8xf32>, vector<8x8xf32> -> vector<8x8xf32>
    %c0_52 = arith.constant 0 : index
    %c24 = arith.constant 24 : index
    %117 = vector.load %arg10[%c0_52, %c24] : memref<16x32xf32, #tpu.memory_space<vmem>>, vector<8x8xf32>
    tpu.vector_store %arg10[%c0_52, %c24], %116 {strides = array<i32>} : memref<16x32xf32, #tpu.memory_space<vmem>>, vector<8x8xf32>,
    %c1_53 = arith.constant 1 : index
    %c0_54 = arith.constant 0 : index
    %c0_55 = arith.constant 0 : index
    %118 = vector.load %arg1[%c1_53, %c0_54, %c0_55] : memref<2x8x8xi32, #tpu.memory_space<vmem>>, vector<1x8x8xi32>
    %119 = vector.shape_cast %118 : vector<1x8x8xi32> to vector<8x8xi32>
    %120 = vector.extract_strided_slice %7 {offsets = [8, 0], sizes = [8, 8], strides = [1, 1]} : vector<16x32xf32> to vector<8x8xf32>
    %121 = vector.extract_strided_slice %11 {offsets = [8, 0], sizes = [8, 8], strides = [1, 1]} : vector<16x32xf32> to vector<8x8xf32>
    %122 = vector.extract_strided_slice %15 {offsets = [8, 0], sizes = [8, 8], strides = [1, 1]} : vector<16x32xf32> to vector<8x8xf32>
    %123 = tpu.transpose %121, [1, 0] : vector<8x8xf32> -> vector<8x8xf32>
    %cst_56 = arith.constant dense<0.000000e+00> : vector<8x8xf32>
    %124 = tpu.matmul %120, %123, %cst_56 {dimension_numbers = #tpu.dot_dimension_numbers<[1], [0], [0], [1], [0, 0, 1, 1], [], []>} : vector<8x8xf32>, vector<8x8xf32>, vector<8x8xf32> -> vector<8x8xf32>
    %cst_57 = arith.constant 0.353553385 : f32
    %125 = vector.broadcast %cst_57 : f32 to vector<8x8xf32>
    %126 = arith.mulf %124, %125 : vector<8x8xf32>
    %c0_i32_58 = arith.constant 0 : i32
    %127 = vector.broadcast %c0_i32_58 : i32 to vector<8x8xi32>
    %128 = arith.cmpi ne, %119, %127 : vector<8x8xi32>
    %cst_59 = arith.constant -1.000000e+09 : f32
    %129 = vector.broadcast %cst_59 : f32 to vector<8x8xf32>
    %130 = arith.select %128, %129, %126 : vector<8x8xi1>, vector<8x8xf32>
    %cst_60 = arith.constant dense<0xFF800000> : vector<8xf32>
    %131 = vector.multi_reduction <maximumf>, %130, %cst_60 [1] : vector<8x8xf32> to vector<8xf32>
    %132 = vector.shape_cast %131 : vector<8xf32> to vector<8x1xf32>
    %133 = vector.broadcast %132 : vector<8x1xf32> to vector<8x8xf32>
    %134 = arith.subf %130, %133 : vector<8x8xf32>
    %135 = math.exp %134 : vector<8x8xf32>
    %cst_61 = arith.constant dense<0.000000e+00> : vector<8xf32>
    %136 = vector.multi_reduction <add>, %135, %cst_61 [1] : vector<8x8xf32> to vector<8xf32>
    %137 = vector.shape_cast %136 : vector<8xf32> to vector<8x1xf32>
    %138 = vector.broadcast %137 : vector<8x1xf32> to vector<8x8xf32>
    %139 = arith.divf %135, %138 : vector<8x8xf32>
    %c1_62 = arith.constant 1 : index
    %c0_63 = arith.constant 0 : index
    %c0_64 = arith.constant 0 : index
    %c0_65 = arith.constant 0 : index
    %140 = vector.load %arg9[%c1_62, %c0_63, %c0_64, %c0_65] : memref<2x4x8x8xf32, #tpu.memory_space<vmem>>, vector<1x1x8x8xf32>
    %141 = vector.shape_cast %140 : vector<1x1x8x8xf32> to vector<8x8xf32>
    %142 = vector.shape_cast %139 : vector<8x8xf32> to vector<1x1x8x8xf32>
    tpu.vector_store %arg9[%c1_62, %c0_63, %c0_64, %c0_65], %142 {strides = array<i32>} : memref<2x4x8x8xf32, #tpu.memory_space<vmem>>, vector<1x1x8x8xf32>,
    %cst_66 = arith.constant dense<0.000000e+00> : vector<8x8xf32>
    %143 = tpu.matmul %139, %122, %cst_66 {dimension_numbers = #tpu.dot_dimension_numbers<[1], [0], [0], [1], [0, 0, 1, 1], [], []>} : vector<8x8xf32>, vector<8x8xf32>, vector<8x8xf32> -> vector<8x8xf32>
    %c8_67 = arith.constant 8 : index
    %c0_68 = arith.constant 0 : index
    %144 = vector.load %arg10[%c8_67, %c0_68] : memref<16x32xf32, #tpu.memory_space<vmem>>, vector<8x8xf32>
    tpu.vector_store %arg10[%c8_67, %c0_68], %143 {strides = array<i32>} : memref<16x32xf32, #tpu.memory_space<vmem>>, vector<8x8xf32>,
    %145 = vector.extract_strided_slice %7 {offsets = [8, 8], sizes = [8, 8], strides = [1, 1]} : vector<16x32xf32> to vector<8x8xf32>
    %146 = vector.extract_strided_slice %11 {offsets = [8, 8], sizes = [8, 8], strides = [1, 1]} : vector<16x32xf32> to vector<8x8xf32>
    %147 = vector.extract_strided_slice %15 {offsets = [8, 8], sizes = [8, 8], strides = [1, 1]} : vector<16x32xf32> to vector<8x8xf32>
    %148 = tpu.transpose %146, [1, 0] : vector<8x8xf32> -> vector<8x8xf32>
    %cst_69 = arith.constant dense<0.000000e+00> : vector<8x8xf32>
    %149 = tpu.matmul %145, %148, %cst_69 {dimension_numbers = #tpu.dot_dimension_numbers<[1], [0], [0], [1], [0, 0, 1, 1], [], []>} : vector<8x8xf32>, vector<8x8xf32>, vector<8x8xf32> -> vector<8x8xf32>
    %cst_70 = arith.constant 0.353553385 : f32
    %150 = vector.broadcast %cst_70 : f32 to vector<8x8xf32>
    %151 = arith.mulf %149, %150 : vector<8x8xf32>
    %c0_i32_71 = arith.constant 0 : i32
    %152 = vector.broadcast %c0_i32_71 : i32 to vector<8x8xi32>
    %153 = arith.cmpi ne, %119, %152 : vector<8x8xi32>
    %cst_72 = arith.constant -1.000000e+09 : f32
    %154 = vector.broadcast %cst_72 : f32 to vector<8x8xf32>
    %155 = arith.select %153, %154, %151 : vector<8x8xi1>, vector<8x8xf32>
    %cst_73 = arith.constant dense<0xFF800000> : vector<8xf32>
    %156 = vector.multi_reduction <maximumf>, %155, %cst_73 [1] : vector<8x8xf32> to vector<8xf32>
    %157 = vector.shape_cast %156 : vector<8xf32> to vector<8x1xf32>
    %158 = vector.broadcast %157 : vector<8x1xf32> to vector<8x8xf32>
    %159 = arith.subf %155, %158 : vector<8x8xf32>
    %160 = math.exp %159 : vector<8x8xf32>
    %cst_74 = arith.constant dense<0.000000e+00> : vector<8xf32>
    %161 = vector.multi_reduction <add>, %160, %cst_74 [1] : vector<8x8xf32> to vector<8xf32>
    %162 = vector.shape_cast %161 : vector<8xf32> to vector<8x1xf32>
    %163 = vector.broadcast %162 : vector<8x1xf32> to vector<8x8xf32>
    %164 = arith.divf %160, %163 : vector<8x8xf32>
    %c1_75 = arith.constant 1 : index
    %c1_76 = arith.constant 1 : index
    %c0_77 = arith.constant 0 : index
    %c0_78 = arith.constant 0 : index
    %165 = vector.load %arg9[%c1_75, %c1_76, %c0_77, %c0_78] : memref<2x4x8x8xf32, #tpu.memory_space<vmem>>, vector<1x1x8x8xf32>
    %166 = vector.shape_cast %165 : vector<1x1x8x8xf32> to vector<8x8xf32>
    %167 = vector.shape_cast %164 : vector<8x8xf32> to vector<1x1x8x8xf32>
    tpu.vector_store %arg9[%c1_75, %c1_76, %c0_77, %c0_78], %167 {strides = array<i32>} : memref<2x4x8x8xf32, #tpu.memory_space<vmem>>, vector<1x1x8x8xf32>,
    %cst_79 = arith.constant dense<0.000000e+00> : vector<8x8xf32>
    %168 = tpu.matmul %164, %147, %cst_79 {dimension_numbers = #tpu.dot_dimension_numbers<[1], [0], [0], [1], [0, 0, 1, 1], [], []>} : vector<8x8xf32>, vector<8x8xf32>, vector<8x8xf32> -> vector<8x8xf32>
    %c8_80 = arith.constant 8 : index
    %c8_81 = arith.constant 8 : index
    %169 = vector.load %arg10[%c8_80, %c8_81] : memref<16x32xf32, #tpu.memory_space<vmem>>, vector<8x8xf32>
    tpu.vector_store %arg10[%c8_80, %c8_81], %168 {strides = array<i32>} : memref<16x32xf32, #tpu.memory_space<vmem>>, vector<8x8xf32>,
    %170 = vector.extract_strided_slice %7 {offsets = [8, 16], sizes = [8, 8], strides = [1, 1]} : vector<16x32xf32> to vector<8x8xf32>
    %171 = vector.extract_strided_slice %11 {offsets = [8, 16], sizes = [8, 8], strides = [1, 1]} : vector<16x32xf32> to vector<8x8xf32>
    %172 = vector.extract_strided_slice %15 {offsets = [8, 16], sizes = [8, 8], strides = [1, 1]} : vector<16x32xf32> to vector<8x8xf32>
    %173 = tpu.transpose %171, [1, 0] : vector<8x8xf32> -> vector<8x8xf32>
    %cst_82 = arith.constant dense<0.000000e+00> : vector<8x8xf32>
    %174 = tpu.matmul %170, %173, %cst_82 {dimension_numbers = #tpu.dot_dimension_numbers<[1], [0], [0], [1], [0, 0, 1, 1], [], []>} : vector<8x8xf32>, vector<8x8xf32>, vector<8x8xf32> -> vector<8x8xf32>
    %cst_83 = arith.constant 0.353553385 : f32
    %175 = vector.broadcast %cst_83 : f32 to vector<8x8xf32>
    %176 = arith.mulf %174, %175 : vector<8x8xf32>
    %c0_i32_84 = arith.constant 0 : i32
    %177 = vector.broadcast %c0_i32_84 : i32 to vector<8x8xi32>
    %178 = arith.cmpi ne, %119, %177 : vector<8x8xi32>
    %cst_85 = arith.constant -1.000000e+09 : f32
    %179 = vector.broadcast %cst_85 : f32 to vector<8x8xf32>
    %180 = arith.select %178, %179, %176 : vector<8x8xi1>, vector<8x8xf32>
    %cst_86 = arith.constant dense<0xFF800000> : vector<8xf32>
    %181 = vector.multi_reduction <maximumf>, %180, %cst_86 [1] : vector<8x8xf32> to vector<8xf32>
    %182 = vector.shape_cast %181 : vector<8xf32> to vector<8x1xf32>
    %183 = vector.broadcast %182 : vector<8x1xf32> to vector<8x8xf32>
    %184 = arith.subf %180, %183 : vector<8x8xf32>
    %185 = math.exp %184 : vector<8x8xf32>
    %cst_87 = arith.constant dense<0.000000e+00> : vector<8xf32>
    %186 = vector.multi_reduction <add>, %185, %cst_87 [1] : vector<8x8xf32> to vector<8xf32>
    %187 = vector.shape_cast %186 : vector<8xf32> to vector<8x1xf32>
    %188 = vector.broadcast %187 : vector<8x1xf32> to vector<8x8xf32>
    %189 = arith.divf %185, %188 : vector<8x8xf32>
    %c1_88 = arith.constant 1 : index
    %c2_89 = arith.constant 2 : index
    %c0_90 = arith.constant 0 : index
    %c0_91 = arith.constant 0 : index
    %190 = vector.load %arg9[%c1_88, %c2_89, %c0_90, %c0_91] : memref<2x4x8x8xf32, #tpu.memory_space<vmem>>, vector<1x1x8x8xf32>
    %191 = vector.shape_cast %190 : vector<1x1x8x8xf32> to vector<8x8xf32>
    %192 = vector.shape_cast %189 : vector<8x8xf32> to vector<1x1x8x8xf32>
    tpu.vector_store %arg9[%c1_88, %c2_89, %c0_90, %c0_91], %192 {strides = array<i32>} : memref<2x4x8x8xf32, #tpu.memory_space<vmem>>, vector<1x1x8x8xf32>,
    %cst_92 = arith.constant dense<0.000000e+00> : vector<8x8xf32>
    %193 = tpu.matmul %189, %172, %cst_92 {dimension_numbers = #tpu.dot_dimension_numbers<[1], [0], [0], [1], [0, 0, 1, 1], [], []>} : vector<8x8xf32>, vector<8x8xf32>, vector<8x8xf32> -> vector<8x8xf32>
    %c8_93 = arith.constant 8 : index
    %c16_94 = arith.constant 16 : index
    %194 = vector.load %arg10[%c8_93, %c16_94] : memref<16x32xf32, #tpu.memory_space<vmem>>, vector<8x8xf32>
    tpu.vector_store %arg10[%c8_93, %c16_94], %193 {strides = array<i32>} : memref<16x32xf32, #tpu.memory_space<vmem>>, vector<8x8xf32>,
    %195 = vector.extract_strided_slice %7 {offsets = [8, 24], sizes = [8, 8], strides = [1, 1]} : vector<16x32xf32> to vector<8x8xf32>
    %196 = vector.extract_strided_slice %11 {offsets = [8, 24], sizes = [8, 8], strides = [1, 1]} : vector<16x32xf32> to vector<8x8xf32>
    %197 = vector.extract_strided_slice %15 {offsets = [8, 24], sizes = [8, 8], strides = [1, 1]} : vector<16x32xf32> to vector<8x8xf32>
    %198 = tpu.transpose %196, [1, 0] : vector<8x8xf32> -> vector<8x8xf32>
    %cst_95 = arith.constant dense<0.000000e+00> : vector<8x8xf32>
    %199 = tpu.matmul %195, %198, %cst_95 {dimension_numbers = #tpu.dot_dimension_numbers<[1], [0], [0], [1], [0, 0, 1, 1], [], []>} : vector<8x8xf32>, vector<8x8xf32>, vector<8x8xf32> -> vector<8x8xf32>
    %cst_96 = arith.constant 0.353553385 : f32
    %200 = vector.broadcast %cst_96 : f32 to vector<8x8xf32>
    %201 = arith.mulf %199, %200 : vector<8x8xf32>
    %c0_i32_97 = arith.constant 0 : i32
    %202 = vector.broadcast %c0_i32_97 : i32 to vector<8x8xi32>
    %203 = arith.cmpi ne, %119, %202 : vector<8x8xi32>
    %cst_98 = arith.constant -1.000000e+09 : f32
    %204 = vector.broadcast %cst_98 : f32 to vector<8x8xf32>
    %205 = arith.select %203, %204, %201 : vector<8x8xi1>, vector<8x8xf32>
    %cst_99 = arith.constant dense<0xFF800000> : vector<8xf32>
    %206 = vector.multi_reduction <maximumf>, %205, %cst_99 [1] : vector<8x8xf32> to vector<8xf32>
    %207 = vector.shape_cast %206 : vector<8xf32> to vector<8x1xf32>
    %208 = vector.broadcast %207 : vector<8x1xf32> to vector<8x8xf32>
    %209 = arith.subf %205, %208 : vector<8x8xf32>
    %210 = math.exp %209 : vector<8x8xf32>
    %cst_100 = arith.constant dense<0.000000e+00> : vector<8xf32>
    %211 = vector.multi_reduction <add>, %210, %cst_100 [1] : vector<8x8xf32> to vector<8xf32>
    %212 = vector.shape_cast %211 : vector<8xf32> to vector<8x1xf32>
    %213 = vector.broadcast %212 : vector<8x1xf32> to vector<8x8xf32>
    %214 = arith.divf %210, %213 : vector<8x8xf32>
    %c1_101 = arith.constant 1 : index
    %c3_102 = arith.constant 3 : index
    %c0_103 = arith.constant 0 : index
    %c0_104 = arith.constant 0 : index
    %215 = vector.load %arg9[%c1_101, %c3_102, %c0_103, %c0_104] : memref<2x4x8x8xf32, #tpu.memory_space<vmem>>, vector<1x1x8x8xf32>
    %216 = vector.shape_cast %215 : vector<1x1x8x8xf32> to vector<8x8xf32>
    %217 = vector.shape_cast %214 : vector<8x8xf32> to vector<1x1x8x8xf32>
    tpu.vector_store %arg9[%c1_101, %c3_102, %c0_103, %c0_104], %217 {strides = array<i32>} : memref<2x4x8x8xf32, #tpu.memory_space<vmem>>, vector<1x1x8x8xf32>,
    %cst_105 = arith.constant dense<0.000000e+00> : vector<8x8xf32>
    %218 = tpu.matmul %214, %197, %cst_105 {dimension_numbers = #tpu.dot_dimension_numbers<[1], [0], [0], [1], [0, 0, 1, 1], [], []>} : vector<8x8xf32>, vector<8x8xf32>, vector<8x8xf32> -> vector<8x8xf32>
    %c8_106 = arith.constant 8 : index
    %c24_107 = arith.constant 24 : index
    %219 = vector.load %arg10[%c8_106, %c24_107] : memref<16x32xf32, #tpu.memory_space<vmem>>, vector<8x8xf32>
    tpu.vector_store %arg10[%c8_106, %c24_107], %218 {strides = array<i32>} : memref<16x32xf32, #tpu.memory_space<vmem>>, vector<8x8xf32>,
    %c0_108 = arith.constant 0 : index
    %c0_109 = arith.constant 0 : index
    %220 = vector.load %arg10[%c0_108, %c0_109] : memref<16x32xf32, #tpu.memory_space<vmem>>, vector<16x32xf32>
    %c0_110 = arith.constant 0 : index
    %c0_111 = arith.constant 0 : index
    %221 = vector.load %arg4[%c0_110, %c0_111] : memref<32x32xf32, #tpu.memory_space<vmem>>, vector<32x32xf32>
    %cst_112 = arith.constant dense<0.000000e+00> : vector<16x32xf32>
    %222 = tpu.matmul %220, %221, %cst_112 {dimension_numbers = #tpu.dot_dimension_numbers<[1], [0], [0], [1], [0, 0, 1, 1], [], []>} : vector<16x32xf32>, vector<32x32xf32>, vector<16x32xf32> -> vector<16x32xf32>
    %c0_113 = arith.constant 0 : index
    %c0_114 = arith.constant 0 : index
    %223 = vector.load %arg5[%c0_113, %c0_114] : memref<1x32xf32, #tpu.memory_space<vmem>>, vector<1x32xf32>
    %224 = vector.broadcast %223 : vector<1x32xf32> to vector<16x32xf32>
    %225 = arith.addf %222, %224 : vector<16x32xf32>
    %226 = vector.extract_strided_slice %0 {offsets = [0, 0], sizes = [16, 32], strides = [1, 1]} : vector<48x32xf32> to vector<16x32xf32>
    %227 = arith.addf %225, %226 : vector<16x32xf32>
    %cst_115 = arith.constant dense<0.000000e+00> : vector<16xf32>
    %228 = vector.multi_reduction <add>, %227, %cst_115 [1] : vector<16x32xf32> to vector<16xf32>
    %229 = vector.shape_cast %228 : vector<16xf32> to vector<16x1xf32>
    %cst_116 = arith.constant 3.200000e+01 : f32
    %230 = vector.broadcast %cst_116 : f32 to vector<16x1xf32>
    %231 = arith.divf %229, %230 : vector<16x1xf32>
    %232 = vector.broadcast %231 : vector<16x1xf32> to vector<16x32xf32>
    %233 = arith.subf %227, %232 : vector<16x32xf32>
    %234 = arith.mulf %233, %233 : vector<16x32xf32>
    %cst_117 = arith.constant dense<0.000000e+00> : vector<16xf32>
    %235 = vector.multi_reduction <add>, %234, %cst_117 [1] : vector<16x32xf32> to vector<16xf32>
    %236 = vector.shape_cast %235 : vector<16xf32> to vector<16x1xf32>
    %cst_118 = arith.constant 3.200000e+01 : f32
    %237 = vector.broadcast %cst_118 : f32 to vector<16x1xf32>
    %238 = arith.divf %236, %237 : vector<16x1xf32>
    %cst_119 = arith.constant 9.99999974E-6 : f32
    %239 = vector.broadcast %cst_119 : f32 to vector<16x1xf32>
    %240 = arith.addf %238, %239 : vector<16x1xf32>
    %241 = math.rsqrt %240 : vector<16x1xf32>
    %242 = vector.broadcast %241 : vector<16x1xf32> to vector<16x32xf32>
    %243 = arith.mulf %233, %242 : vector<16x32xf32>
    %c0_120 = arith.constant 0 : index
    %c0_121 = arith.constant 0 : index
    %244 = vector.load %arg6[%c0_120, %c0_121] : memref<1x32xf32, #tpu.memory_space<vmem>>, vector<1x32xf32>
    %245 = vector.broadcast %244 : vector<1x32xf32> to vector<16x32xf32>
    %246 = arith.mulf %243, %245 : vector<16x32xf32>
    %c0_122 = arith.constant 0 : index
    %c0_123 = arith.constant 0 : index
    %247 = vector.load %arg7[%c0_122, %c0_123] : memref<1x32xf32, #tpu.memory_space<vmem>>, vector<1x32xf32>
    %248 = vector.broadcast %247 : vector<1x32xf32> to vector<16x32xf32>
    %249 = arith.addf %246, %248 : vector<16x32xf32>
    %c0_124 = arith.constant 0 : index
    %c0_125 = arith.constant 0 : index
    %250 = vector.load %arg8[%c0_124, %c0_125] : memref<16x32xf32, #tpu.memory_space<vmem>>, vector<16x32xf32>
    tpu.vector_store %arg8[%c0_124, %c0_125], %249 {strides = array<i32>} : memref<16x32xf32, #tpu.memory_space<vmem>>, vector<16x32xf32>,
    return
  }
}

</mosaic_0001>

<bundles_post_ra>
// kernel: tpu_custom_call.1
= control target key start
LH: loop header
LB: loop body
LE: loop exit
PB: predicated region body
PF: predicated region fallthrough
CT: control target
= control target key end

     0   :  { %15 = vsyncpa [#allocation4], 0  ;;  %s1409_s0 = inlined_call_operand.vmem [shape: f32[48,32], index: 0, kind: input, shape index: {}]   ;;  %s1410_s1 = inlined_call_operand.vmem [shape: s32[2,8,8], index: 1, kind: input, shape index: {}]   ;;  %s1411_s2 = inlined_call_operand.vmem [shape: f32[32,96], index: 2, kind: input, shape index: {}]   ;;  %s1412_s3 = inlined_call_operand.vmem [shape: f32[1,96], index: 3, kind: input, shape index: {}]   ;;  %s1413_s4 = inlined_call_operand.vmem [shape: f32[32,32], index: 4, kind: input, shape index: {}]   ;;  %s1414_s5 = inlined_call_operand.vmem [shape: f32[1,32], index: 5, kind: input, shape index: {}]   ;;  %s1415_s6 = inlined_call_operand.vmem [shape: f32[1,32], index: 6, kind: input, shape index: {}]   ;;  %s1416_s7 = inlined_call_operand.vmem [shape: f32[1,32], index: 7, kind: input, shape index: {}]   ;;  %s1417_s8 = inlined_call_operand.hbm [shape: f32[16,32], index: 8, kind: output, shape index: {0}]   ;;  %s1418_s9 = inlined_call_operand.hbm [shape: f32[2,4,8,8], index: 9, kind: output, shape index: {1}]  }
   0x1   :  { %v42_v0 = vld [vmem:[%s1411_s2 + $0x18] sm:$0xff]  ;;  %v41_v1 = vld [vmem:[%s1411_s2 + $0x10] sm:$0xff]  ;;  %v40_v2 = vld [vmem:[%s1411_s2 + $0x8] sm:$0xff] }
   0x2   :  { %74 = vmatpush.msra.mxu0 %v42_v0 }
   0x4   :  { %75 = vmatpush.msra.mxu0 %v41_v1 }
   0x5   :  { %16 = vsyncpa [#allocation6], 0  ;;  %v39_v3 = vld [vmem:[%s1411_s2] sm:$0xff]  ;;  %vm43_vm0 = vcmask 261120   ;;  %v1182_v5 = vld [vmem:[%s1409_s0 + $0x8] sm:$0xff]  ;;  %s1092_s28 = smov 120  }
   0x6   :  { %76 = vmatpush.msra.mxu0 %v40_v2  ;;  %v1175_v4 = vld [vmem:[%s1409_s0] sm:$0xff]  ;;  %v35_v6 = vld [vmem:[%s1409_s0 + $0x10] sm:$0xff]  ;;  %v36_v7 = vld [vmem:[%s1409_s0 + $0x18] sm:$0xff]  ;;  %s1094_s29 = smov 88   ;;  %vm111_vm1 = vcmask 64512   ;;  %s1095_s30 = smov 64  }
   0x7   :  { %v1197_v8 = vld [vmem:[%s1412_s3] ss:$0 sm:$0xff]  ;;  %s1093_s3 = smov 96   ;;  %s1096_s10 = smov 56  }
   0x8   :  { %77 = vmatpush.msra.mxu0 %v39_v3  ;;  %v37_v11 = vld [vmem:[%s1409_s0 + $0x20] sm:$0xff]  ;;  %s1097_s13 = smov 104   ;;  %s1098_s14 = smov 72  }
   0x9   :  { %947 = vmatmul.msk.f32.vlgmr.msra.gmra.mxu0 %vm43_vm0, %v1175_v4  ;;  %v1230_v21 = vld [vmem:[%s1410_s1] sm:$0xff]  ;;  %s1099_s15 = smov 80   ;;  %s1100_s16 = smov 112  }
   0xa   :  { %vm138_vm2 = vcmp.ne.s32.totalorder %v1230_v21, 0  ;;  %s1101_s17 = smov 48   ;;  %s1102_s18 = smov 40  }
   0xb   :  { %s1104_s21 = smov 24   ;;  %s1105_s22 = smov 8  }
   0xc   :  { %s917_s20 = sshll.u32 %s1417_s8, 4  ;;  %s918_s20 = int_to_ptr.hbm [resolvable:$true] %s917_s20 }
  0x11   :  { %948 = vmatmul.msk.f32.gmra.mxu0 %vm43_vm0, %v1182_v5 }
  0x19   :  { %949 = vmatmul.msk.f32.gmra.mxu0 %vm43_vm0, %v35_v6 }
  0x21   :  { %950 = vmatmul.msk.f32.gmra.mxu0 %vm43_vm0, %v36_v7 }
  0x29   :  { %951 = vmatmul.msk.f32.gmra.mxu0 %vm43_vm0, %v37_v11 }
  0x86   :  { %v79_v9 = vpop.f32.mrf.mxu0 }
  0x87   :  { %v1200_v10 = vadd.f32 %v1197_v8, %v79_v9 }
  0x89   :  { %193 = vrot.lane.b32.xlu1 %v1200_v10, %s1092_s28 }
  0x8e   :  { %v1208_v12 = vpop.f32.mrf.mxu0 }
  0x96   :  { %v85_v13 = vpop.f32.mrf.mxu0 }
  0x97   :  { %v103_v14 = vadd.f32 %v1197_v8, %v85_v13 }
  0x99   :  { %109 = vrot.lane.b32.xlu0 %v103_v14, %s1093_s3 }
  0x9e   :  { %v1213_v15 = vpop.f32.mrf.mxu0 }
  0xa1   :  { %195 = vrot.lane.b32.xlu0 %v103_v14, %s1094_s29 }
  0xa6   :  { %v91_v16 = vpop.f32.mrf.mxu0 }
  0xa7   :  { %v1216_v17 = vadd.f32 %v1197_v8, %v91_v16 }
  0xa9   :  { %166 = vrot.lane.b32.xlu2 %v1216_v17, %s1095_s30 }
  0xb1   :  { %249 = vrot.lane.b32.xlu2 %v1216_v17, %s1096_s10 }
  0xfb   :  { %v194_v20 = vpop.permute.xlu1 %193 }
 0x103   :  { %v167_v26 = vpop.permute.xlu2 %166 }
 0x104   :  { %187 = vmatpush.msra.mxu2 %v167_v26 }
 0x10b   :  { %v110_v18 = vpop.permute.xlu0 %109  ;;  %v250_v31 = vpop.permute.xlu2 %249 }
 0x10c   :  { %953 = vmatpush.xpose.msk.msra.mxu3 %vm111_vm1, %v110_v18  ;;  %270 = vmatpush.msrb.mxu2 %v250_v31 }
 0x10f   :  { %954 = vmatmul.msk.f32.vlgmr.msra.gmra.mxu3 %vm111_vm1, %v1200_v10 }
 0x113   :  { %v196_v19 = vpop.permute.xlu0 %195 }
 0x114   :  { %956 = vmatpush.xpose.msk.msrb.mxu3 %vm111_vm1, %v196_v19 }
 0x117   :  { %957 = vmatmul.msk.f32.vlgmr.msrb.gmra.mxu3 %vm111_vm1, %v194_v20 }
 0x192   :  { %v134_v22 = vpop.f32.mrf.mxu3 }
 0x193   :  { %v137_v23 = vmul.f32 0.35355338, %v134_v22 }
 0x195   :  { %v139_v24 = vsel %vm138_vm2, -1e+09, %v137_v23 }
 0x196   :  { %v140_v25 = vsel %vm111_vm1, %v139_v24, -inf }
 0x197   :  { %141 = vmax.xlane.f32.xlu1 %v140_v25 }
 0x19a   :  { %v218_v27 = vpop.f32.mrf.mxu3 }
 0x19b   :  { %v221_v28 = vmul.f32 0.35355338, %v218_v27 }
 0x19d   :  { %v222_v29 = vsel %vm138_vm2, -1e+09, %v221_v28 }
 0x19e   :  { %v223_v30 = vsel %vm111_vm1, %v222_v29, -inf }
 0x19f   :  { %224 = vmax.xlane.f32.xlu2 %v223_v30 }
 0x1b0   :  { %369 = vrot.lane.b32.xlu1 %v1200_v10, %s1097_s13 }
 0x1b7   :  { %371 = vrot.lane.b32.xlu2 %v103_v14, %s1098_s14 }
 0x20a   :  { %v142_v32 = vpop.xlane.xlu1 %141 }
 0x20b   :  { %v143_v33 = vsub.f32 %v139_v24, %v142_v32 }
 0x20d   :  { %v144_v34 = vmul.f32 1.442695, %v143_v33 }
 0x20f   :  { %1002 = vpow2.f32 %v144_v34  ;;  %v1278_v34 = vadd.f32 %v1197_v8, %v1208_v12 }
 0x212   :  { %v225_v35 = vpop.xlane.xlu2 %224 }
 0x213   :  { %v226_v36 = vsub.f32 %v222_v29, %v225_v35 }
 0x215   :  { %v1003_v37 = vpop.eup %1002  ;;  %v227_v38 = vmul.f32 1.442695, %v226_v36 }
 0x216   :  { %v146_v39 = vsel %vm111_vm1, %v1003_v37, 0.0 }
 0x217   :  { %1004 = vpow2.f32 %v227_v38  ;;  %147 = vadd.xlane.f32.xlu2 %v146_v39  ;;  %v38_v38 = vld [vmem:[%s1409_s0 + $0x28] sm:$0xff] }
 0x218   :  { %952 = vmatmul.msk.f32.gmra.mxu0 %vm43_vm0, %v38_v38 }
 0x21a   :  { %v372_v42 = vpop.permute.xlu2 %371 }
 0x21d   :  { %v1005_v40 = vpop.eup %1004 }
 0x21e   :  { %v229_v41 = vsel %vm111_vm1, %v1005_v40, 0.0 }
 0x21f   :  { %230 = vadd.xlane.f32.xlu0 %v229_v41 }
 0x222   :  { %v370_v7 = vpop.permute.xlu1 %369 }
 0x22f   :  { %283 = vrot.lane.b32.xlu2 %v103_v14, %s1099_s15 }
 0x233   :  { %281 = vrot.lane.b32.xlu0 %v1200_v10, %s1100_s16 }
 0x28a   :  { %v148_v43 = vpop.xlane.xlu2 %147 }
 0x28b   :  { %1006 = vrcp.f32 %v148_v43  ;;  %v160_v49 = vand.u32 2147483648, %v148_v43  ;;  %v158_v51 = vand.u32 2147483647, %v148_v43  ;;  %vm154_vm4 = vweird.f32 %v148_v43 }
 0x28d   :  { %v161_v54 = vor.u32 1.1754944e-38, %v160_v49  ;;  %vm159_vm6 = vcmp.eq.f32.partialorder %v158_v51, 8.507059e+37 }
 0x291   :  { %v1007_v44 = vpop.eup %1006 }
 0x292   :  { %v150_v45 = vmul.f32 %v1007_v44, %v148_v43  ;;  %v231_v46 = vpop.xlane.xlu0 %230  ;;  %v284_v47 = vpop.permute.xlu2 %283  ;;  %vm155_vm3 = vweird.f32 %v1007_v44 }
 0x293   :  { %1008 = vrcp.f32 %v231_v46  ;;  %959 = vmatpush.xpose.msk.msra.mxu1 %vm111_vm1, %v284_v47  ;;  %vm156_vm5 = vmor %vm154_vm4, %vm155_vm3  ;;  %v243_v60 = vand.u32 2147483648, %v231_v46  ;;  %v241_v62 = vand.u32 2147483647, %v231_v46  ;;  %vm237_vm8 = vweird.f32 %v231_v46 }
 0x294   :  { %v151_v48 = vsub.f32 1.0, %v150_v45 }
 0x295   :  { %v244_v0 = vor.u32 1.1754944e-38, %v243_v60  ;;  %vm242_vm10 = vcmp.eq.f32.partialorder %v241_v62, 8.507059e+37 }
 0x296   :  { %v152_v50 = vmul.f32 %v1007_v44, %v151_v48 }
 0x298   :  { %v153_v52 = vadd.f32 %v1007_v44, %v152_v50 }
 0x299   :  { %v1009_v53 = vpop.eup %1008 }
 0x29a   :  { %v233_v55 = vmul.f32 %v1009_v53, %v231_v46  ;;  %v157_v56 = vsel %vm156_vm5, %v1007_v44, %v153_v52  ;;  %vm238_vm7 = vweird.f32 %v1009_v53 }
 0x29b   :  { %v162_v57 = vsel %vm159_vm6, %v161_v54, %v157_v56  ;;  %vm239_vm9 = vmor %vm237_vm8, %vm238_vm7 }
 0x29c   :  { %v234_v58 = vsub.f32 1.0, %v233_v55  ;;  %v163_v59 = vmul.f32 %v1003_v37, %v162_v57 }
 0x29e   :  { %v235_v61 = vmul.f32 %v1009_v53, %v234_v58  ;;  %164 = vst.msk [vmem:[#allocation5] sm:$0xff] %vm111_vm1, %v163_v59  ;;  %955 = vmatmul.msk.f32.vlgmr.msra.gmra.mxu2 %vm111_vm1, %v163_v59 }
 0x29f   :  { %962 = vmatpush.xpose.msk.msra.mxu2 %vm111_vm1, %v372_v42 }
 0x2a0   :  { %v236_v63 = vadd.f32 %v1009_v53, %v235_v61  ;;  %v94_v61 = vpop.f32.mrf.mxu0 }
 0x2a1   :  { %v1298_v62 = vadd.f32 %v1197_v8, %v94_v61 }
 0x2a2   :  { %v240_v1 = vsel %vm239_vm9, %v1009_v53, %v236_v63 }
 0x2a3   :  { %v245_v2 = vsel %vm242_vm10, %v244_v0, %v240_v1  ;;  %v1307_v0 = vld [vmem:[%s1410_s1 + $0x8] sm:$0xff]  ;;  %s1103_s1 = smov 16  }
 0x2a4   :  { %v246_v3 = vmul.f32 %v1005_v40, %v245_v2  ;;  %vm488_vm5 = vcmp.ne.s32.totalorder %v1307_v0, 0 }
 0x2a5   :  { %v282_v6 = vpop.permute.xlu0 %281 }
 0x2a6   :  { %248 = vst.msk [vmem:[#allocation5 + $0x8] sm:$0xff] %vm111_vm1, %v246_v3  ;;  %958 = vmatmul.msk.f32.vlgmr.msrb.gmra.mxu2 %vm111_vm1, %v246_v3  ;;  %960 = vmatmul.msk.f32.vlgmr.msra.gmra.mxu1 %vm111_vm1, %v282_v6 }
 0x2ae   :  { %963 = vmatmul.msk.f32.vlgmr.msra.gmra.mxu2 %vm111_vm1, %v370_v7 }
 0x321   :  { %v189_v9 = vpop.f32.mrf.mxu2 }
 0x322   :  { %192 = vst.msk [vmem:[#allocation2] sm:$0xff] %vm111_vm1, %v189_v9 }
 0x323   :  { %v306_v10 = vpop.f32.mrf.mxu1 }
 0x324   :  { %v309_v11 = vmul.f32 0.35355338, %v306_v10 }
 0x326   :  { %v310_v13 = vsel %vm138_vm2, -1e+09, %v309_v11 }
 0x327   :  { %v311_v14 = vsel %vm111_vm1, %v310_v13, -inf }
 0x328   :  { %312 = vmax.xlane.f32.xlu2 %v311_v14 }
 0x329   :  { %v1259_v16 = vpop.f32.mrf.mxu2 }
 0x331   :  { %v394_v18 = vpop.f32.mrf.mxu2 }
 0x332   :  { %v397_v19 = vmul.f32 0.35355338, %v394_v18 }
 0x334   :  { %v398_v20 = vsel %vm138_vm2, -1e+09, %v397_v19 }
 0x335   :  { %v399_v22 = vsel %vm111_vm1, %v398_v20, -inf }
 0x336   :  { %400 = vmax.xlane.f32.xlu1 %v399_v22 }
 0x340   :  { %337 = vrot.lane.b32.xlu2 %v1216_v17, %s1101_s17 }
 0x34f   :  { %425 = vrot.lane.b32.xlu1 %v1216_v17, %s1102_s18  ;;  %v1272_v17 = vadd.f32 %v1197_v8, %v1213_v15 }
 0x39b   :  { %v313_v23 = vpop.xlane.xlu2 %312 }
 0x39c   :  { %v314_v24 = vsub.f32 %v310_v13, %v313_v23 }
 0x39e   :  { %v315_v25 = vmul.f32 1.442695, %v314_v24 }
 0x3a0   :  { %1010 = vpow2.f32 %v315_v25 }
 0x3a3   :  { %v338_v26 = vpop.permute.xlu2 %337 }
 0x3a4   :  { %358 = vmatpush.msra.mxu3 %v338_v26 }
 0x3a6   :  { %v1011_v27 = vpop.eup %1010 }
 0x3a7   :  { %v317_v21 = vsel %vm111_vm1, %v1011_v27, 0.0 }
 0x3a8   :  { %318 = vadd.xlane.f32.xlu0 %v317_v21 }
 0x3a9   :  { %v401_v28 = vpop.xlane.xlu1 %400 }
 0x3aa   :  { %v402_v29 = vsub.f32 %v398_v20, %v401_v28 }
 0x3ac   :  { %v403_v30 = vmul.f32 1.442695, %v402_v29 }
 0x3ae   :  { %1012 = vpow2.f32 %v403_v30 }
 0x3b4   :  { %v1013_v31 = vpop.eup %1012 }
 0x3b5   :  { %v405_v32 = vsel %vm111_vm1, %v1013_v31, 0.0 }
 0x3b6   :  { %406 = vadd.xlane.f32.xlu2 %v405_v32 }
 0x3bc   :  { %460 = vrot.lane.b32.xlu0 %v1272_v17, %s1093_s3 }
 0x3c1   :  { %v426_v33 = vpop.permute.xlu1 %425 }
 0x3c2   :  { %446 = vmatpush.msrb.mxu1 %v426_v33 }
 0x3c4   :  { %544 = vrot.lane.b32.xlu0 %v1278_v34, %s1092_s28 }
 0x3cc   :  { %517 = vrot.lane.b32.xlu0 %v1298_v62, %s1095_s30 }
 0x3ce   :  { %546 = vrot.lane.b32.xlu2 %v1272_v17, %s1094_s29 }
 0x41b   :  { %v319_v35 = vpop.xlane.xlu0 %318 }
 0x41c   :  { %1014 = vrcp.f32 %v319_v35  ;;  %v331_v39 = vand.u32 2147483648, %v319_v35  ;;  %v329_v40 = vand.u32 2147483647, %v319_v35  ;;  %vm325_vm12 = vweird.f32 %v319_v35 }
 0x41e   :  { %v332_v43 = vor.u32 1.1754944e-38, %v331_v39  ;;  %vm330_vm14 = vcmp.eq.f32.partialorder %v329_v40, 8.507059e+37 }
 0x422   :  { %v1015_v36 = vpop.eup %1014 }
 0x423   :  { %v321_v15 = vmul.f32 %v1015_v36, %v319_v35  ;;  %vm326_vm11 = vweird.f32 %v1015_v36 }
 0x424   :  { %vm327_vm13 = vmor %vm325_vm12, %vm326_vm11 }
 0x425   :  { %v322_v37 = vsub.f32 1.0, %v321_v15 }
 0x427   :  { %v323_v12 = vmul.f32 %v1015_v36, %v322_v37 }
 0x429   :  { %v324_v41 = vadd.f32 %v1015_v36, %v323_v12  ;;  %v407_v42 = vpop.xlane.xlu2 %406 }
 0x42a   :  { %1016 = vrcp.f32 %v407_v42  ;;  %v419_v52 = vand.u32 2147483648, %v407_v42  ;;  %v417_v54 = vand.u32 2147483647, %v407_v42  ;;  %vm413_vm2 = vweird.f32 %v407_v42 }
 0x42b   :  { %v328_v44 = vsel %vm327_vm13, %v1015_v36, %v324_v41 }
 0x42c   :  { %v333_v45 = vsel %vm330_vm14, %v332_v43, %v328_v44  ;;  %v420_v56 = vor.u32 1.1754944e-38, %v419_v52  ;;  %vm418_vm4 = vcmp.eq.f32.partialorder %v417_v54, 8.507059e+37  ;;  %vm279_vm14 = vcmask 130112  }
 0x42d   :  { %v334_v46 = vmul.f32 %v1011_v27, %v333_v45 }
 0x42e   :  { %v461_v47 = vpop.permute.xlu0 %460 }
 0x42f   :  { %336 = vst.msk [vmem:[#allocation5 + $0x10] sm:$0xff] %vm111_vm1, %v334_v46  ;;  %961 = vmatmul.msk.f32.vlgmr.msra.gmra.mxu3 %vm111_vm1, %v334_v46 }
 0x430   :  { %v1017_v48 = vpop.eup %1016  ;;  %966 = vmatpush.xpose.msk.msrb.mxu3 %vm111_vm1, %v461_v47 }
 0x431   :  { %v409_v49 = vmul.f32 %v1017_v48, %v407_v42  ;;  %v547_v50 = vpop.permute.xlu2 %546  ;;  %vm414_vm15 = vweird.f32 %v1017_v48 }
 0x432   :  { %969 = vmatpush.xpose.msk.msra.mxu1 %vm111_vm1, %v547_v50  ;;  %vm415_vm3 = vmor %vm413_vm2, %vm414_vm15  ;;  %vm367_vm15 = vcmask 195712   ;;  %vm455_vm2 = vcmask 261312  }
 0x433   :  { %v410_v51 = vsub.f32 1.0, %v409_v49 }
 0x435   :  { %v411_v53 = vmul.f32 %v1017_v48, %v410_v51 }
 0x436   :  { %v545_v60 = vpop.permute.xlu0 %544 }
 0x437   :  { %v412_v55 = vadd.f32 %v1017_v48, %v411_v53  ;;  %967 = vmatmul.msk.f32.vlgmr.msrb.gmra.mxu3 %vm111_vm1, %v1278_v34 }
 0x439   :  { %v416_v57 = vsel %vm415_vm3, %v1017_v48, %v412_v55 }
 0x43a   :  { %v421_v58 = vsel %vm418_vm4, %v420_v56, %v416_v57 }
 0x43b   :  { %v422_v59 = vmul.f32 %v1013_v31, %v421_v58 }
 0x43d   :  { %424 = vst.msk [vmem:[#allocation5 + $0x18] sm:$0xff] %vm111_vm1, %v422_v59  ;;  %964 = vmatmul.msk.f32.vlgmr.msrb.gmra.mxu1 %vm111_vm1, %v422_v59 }
 0x43e   :  { %v518_v13 = vpop.permute.xlu0 %517 }
 0x43f   :  { %538 = vmatpush.msrb.mxu2 %v518_v13 }
 0x445   :  { %970 = vmatmul.msk.f32.vlgmr.msra.gmra.mxu1 %vm111_vm1, %v545_v60 }
 0x4b2   :  { %v1302_v63 = vpop.f32.mrf.mxu3 }
 0x4ba   :  { %v1309_v1 = vpop.f32.mrf.mxu1  ;;  %v484_v2 = vpop.f32.mrf.mxu3 }
 0x4bb   :  { %v487_v3 = vmul.f32 0.35355338, %v484_v2 }
 0x4bd   :  { %v489_v8 = vsel %vm488_vm5, -1e+09, %v487_v3 }
 0x4be   :  { %v490_v6 = vsel %vm111_vm1, %v489_v8, -inf }
 0x4bf   :  { %491 = vmax.xlane.f32.xlu2 %v490_v6 }
 0x4c2   :  { %v569_v7 = vpop.f32.mrf.mxu1 }
 0x4c3   :  { %v572_v9 = vmul.f32 0.35355338, %v569_v7 }
 0x4c5   :  { %v573_v10 = vsel %vm488_vm5, -1e+09, %v572_v9 }
 0x4c6   :  { %v574_v11 = vsel %vm111_vm1, %v573_v10, -inf }
 0x4c7   :  { %575 = vmax.xlane.f32.xlu1 %v574_v11 }
 0x4d7   :  { %600 = vrot.lane.b32.xlu2 %v1298_v62, %s1096_s10 }
 0x4df   :  { %633 = vrot.lane.b32.xlu2 %v1272_v17, %s1099_s15 }
 0x532   :  { %v492_v14 = vpop.xlane.xlu2 %491 }
 0x533   :  { %v493_v18 = vsub.f32 %v489_v8, %v492_v14 }
 0x535   :  { %v494_v19 = vmul.f32 1.442695, %v493_v18 }
 0x537   :  { %1018 = vpow2.f32 %v494_v19 }
 0x53a   :  { %v576_v20 = vpop.xlane.xlu1 %575  ;;  %v601_v22 = vpop.permute.xlu2 %600 }
 0x53b   :  { %v577_v23 = vsub.f32 %v573_v10, %v576_v20  ;;  %621 = vmatpush.msra.mxu3 %v601_v22 }
 0x53d   :  { %v1019_v24 = vpop.eup %1018  ;;  %v578_v25 = vmul.f32 1.442695, %v577_v23 }
 0x53e   :  { %v496_v26 = vsel %vm111_vm1, %v1019_v24, 0.0 }
 0x53f   :  { %1020 = vpow2.f32 %v578_v25  ;;  %497 = vadd.xlane.f32.xlu1 %v496_v26 }
 0x542   :  { %v634_v27 = vpop.permute.xlu2 %633 }
 0x543   :  { %972 = vmatpush.xpose.msk.msra.mxu2 %vm111_vm1, %v634_v27 }
 0x545   :  { %v1021_v21 = vpop.eup %1020 }
 0x546   :  { %v580_v28 = vsel %vm111_vm1, %v1021_v21, 0.0 }
 0x547   :  { %581 = vadd.xlane.f32.xlu0 %v580_v28 }
 0x558   :  { %720 = vrot.lane.b32.xlu1 %v1272_v17, %s1098_s14 }
 0x55b   :  { %718 = vrot.lane.b32.xlu0 %v1278_v34, %s1097_s13  ;;  %s1107_s13 = smov [#allocation5]  }
 0x560   :  { %631 = vrot.lane.b32.xlu1 %v1278_v34, %s1100_s16  ;;  %s930_s16 = sshll.u32 %s1418_s9, 4  ;;  %s1109_s9 = smov [#allocation3]   ;;  %s931_s16 = int_to_ptr.hbm [resolvable:$true] %s930_s16 }
 0x5b2   :  { %v498_v29 = vpop.xlane.xlu1 %497 }
 0x5b3   :  { %1022 = vrcp.f32 %v498_v29  ;;  %v510_v35 = vand.u32 2147483648, %v498_v29  ;;  %v508_v15 = vand.u32 2147483647, %v498_v29  ;;  %vm504_vm7 = vweird.f32 %v498_v29 }
 0x5b5   :  { %v511_v38 = vor.u32 1.1754944e-38, %v510_v35  ;;  %vm509_vm9 = vcmp.eq.f32.partialorder %v508_v15, 8.507059e+37 }
 0x5b9   :  { %v1023_v30 = vpop.eup %1022 }
 0x5ba   :  { %v500_v31 = vmul.f32 %v1023_v30, %v498_v29  ;;  %v582_v32 = vpop.xlane.xlu0 %581  ;;  %vm505_vm6 = vweird.f32 %v1023_v30 }
 0x5bb   :  { %1024 = vrcp.f32 %v582_v32  ;;  %vm506_vm8 = vmor %vm504_vm7, %vm505_vm6  ;;  %v594_v42 = vand.u32 2147483648, %v582_v32  ;;  %v592_v44 = vand.u32 2147483647, %v582_v32  ;;  %vm588_vm11 = vweird.f32 %v582_v32 }
 0x5bc   :  { %v501_v33 = vsub.f32 1.0, %v500_v31 }
 0x5bd   :  { %v595_v46 = vor.u32 1.1754944e-38, %v594_v42  ;;  %vm593_vm13 = vcmp.eq.f32.partialorder %v592_v44, 8.507059e+37  ;;  %v809_v42 = vld [vmem:[%s1413_s4 + $0x10] sm:$0xff]  ;;  %v807_v44 = vld [vmem:[%s1413_s4] sm:$0xff] }
 0x5be   :  { %v502_v36 = vmul.f32 %v1023_v30, %v501_v33 }
 0x5c0   :  { %v503_v37 = vadd.f32 %v1023_v30, %v502_v36 }
 0x5c1   :  { %v1025_v17 = vpop.eup %1024 }
 0x5c2   :  { %v507_v39 = vsel %vm506_vm8, %v1023_v30, %v503_v37  ;;  %v584_v12 = vmul.f32 %v1025_v17, %v582_v32  ;;  %vm589_vm10 = vweird.f32 %v1025_v17 }
 0x5c3   :  { %v512_v34 = vsel %vm509_vm9, %v511_v38, %v507_v39  ;;  %vm590_vm12 = vmor %vm588_vm11, %vm589_vm10 }
 0x5c4   :  { %v585_v40 = vsub.f32 1.0, %v584_v12  ;;  %v513_v41 = vmul.f32 %v1019_v24, %v512_v34 }
 0x5c6   :  { %v586_v43 = vmul.f32 %v1025_v17, %v585_v40  ;;  %515 = vst.msk [vmem:[#allocation5 + $0x20] sm:$0xff] %vm111_vm1, %v513_v41  ;;  %968 = vmatmul.msk.f32.vlgmr.msrb.gmra.mxu2 %vm111_vm1, %v513_v41  ;;  %v810_v41 = vld [vmem:[%s1413_s4 + $0x18] sm:$0xff] }
 0x5c8   :  { %v587_v45 = vadd.f32 %v1025_v17, %v586_v43  ;;  %v808_v43 = vld [vmem:[%s1413_s4 + $0x8] sm:$0xff] }
 0x5ca   :  { %v591_v47 = vsel %vm590_vm12, %v1025_v17, %v587_v45  ;;  %v721_v48 = vpop.permute.xlu1 %720 }
 0x5cb   :  { %v596_v49 = vsel %vm593_vm13, %v595_v46, %v591_v47  ;;  %975 = vmatpush.xpose.msk.msrb.mxu3 %vm111_vm1, %v721_v48  ;;  %v999_v48 = vld [vmem:[%s1414_s5] ss:$0 sm:$0xff] }
 0x5cc   :  { %v597_v50 = vmul.f32 %v1021_v21, %v596_v49 }
 0x5cd   :  { %v719_v52 = vpop.permute.xlu0 %718 }
 0x5ce   :  { %599 = vst.msk [vmem:[#allocation5 + $0x28] sm:$0xff] %vm111_vm1, %v597_v50  ;;  %971 = vmatmul.msk.f32.vlgmr.msra.gmra.mxu3 %vm111_vm1, %v597_v50 }
 0x5d2   :  { %v632_v51 = vpop.permute.xlu1 %631 }
 0x5d3   :  { %973 = vmatmul.msk.f32.vlgmr.msra.gmra.mxu2 %vm111_vm1, %v632_v51 }
 0x5d6   :  { %976 = vmatmul.msk.f32.vlgmr.msrb.gmra.mxu3 %vm111_vm1, %v719_v52 }
 0x649   :  { %v540_v53 = vpop.f32.mrf.mxu2 }
 0x64a   :  { %543 = vst.msk [vmem:[#allocation2 + $0x8] sm:$0xff] %vm111_vm1, %v540_v53  ;;  %v1106_v53 = vmov 32.0  }
 0x651   :  { %v623_v54 = vpop.f32.mrf.mxu3 }
 0x656   :  { %v656_v55 = vpop.f32.mrf.mxu2 }
 0x657   :  { %v659_v56 = vmul.f32 0.35355338, %v656_v55 }
 0x659   :  { %v743_v57 = vpop.f32.mrf.mxu3  ;;  %v660_v58 = vsel %vm488_vm5, -1e+09, %v659_v56 }
 0x65a   :  { %v746_v59 = vmul.f32 0.35355338, %v743_v57  ;;  %v661_v60 = vsel %vm111_vm1, %v660_v58, -inf }
 0x65b   :  { %662 = vmax.xlane.f32.xlu2 %v661_v60 }
 0x65c   :  { %v747_v61 = vsel %vm488_vm5, -1e+09, %v746_v59 }
 0x65d   :  { %v748_v2 = vsel %vm111_vm1, %v747_v61, -inf }
 0x65e   :  { %749 = vmax.xlane.f32.xlu0 %v748_v2 }
 0x672   :  { %774 = vrot.lane.b32.xlu0 %v1298_v62, %s1102_s18 }
 0x67a   :  { %364 = vrot.lane.b32.xlu0 %v1302_v63, %s1103_s1 }
 0x682   :  { %452 = vrot.lane.b32.xlu0 %v1309_v1, %s1104_s21 }
 0x6ce   :  { %v663_v3 = vpop.xlane.xlu2 %662 }
 0x6cf   :  { %v664_v8 = vsub.f32 %v660_v58, %v663_v3 }
 0x6d1   :  { %v665_v6 = vmul.f32 1.442695, %v664_v8  ;;  %v750_v7 = vpop.xlane.xlu0 %749 }
 0x6d2   :  { %v751_v0 = vsub.f32 %v747_v61, %v750_v7 }
 0x6d3   :  { %1026 = vpow2.f32 %v665_v6 }
 0x6d4   :  { %v752_v9 = vmul.f32 1.442695, %v751_v0 }
 0x6d6   :  { %1028 = vpow2.f32 %v752_v9 }
 0x6d9   :  { %v1027_v10 = vpop.eup %1026 }
 0x6da   :  { %v667_v11 = vsel %vm111_vm1, %v1027_v10, 0.0 }
 0x6db   :  { %668 = vadd.xlane.f32.xlu2 %v667_v11 }
 0x6dc   :  { %v1029_v13 = vpop.eup %1028 }
 0x6dd   :  { %v754_v14 = vsel %vm111_vm1, %v1029_v13, 0.0 }
 0x6de   :  { %755 = vadd.xlane.f32.xlu1 %v754_v14 }
 0x6e4   :  { %v775_v63 = vpop.permute.xlu0 %774 }
 0x6e5   :  { %795 = vmatpush.msrb.mxu2 %v775_v63 }
 0x6ec   :  { %v365_v1 = vpop.permute.xlu0 %364 }
 0x6f3   :  { %276 = vrot.lane.b32.xlu2 %v1259_v16, %s1105_s22 }
 0x6f4   :  { %v453_v16 = vpop.permute.xlu0 %452 }
 0x6f7   :  { %687 = vrot.lane.b32.xlu1 %v1298_v62, %s1101_s17  ;;  %s915_s17 = sshll.u32 %s1109_s9, 4  ;;  %s916_s17 = int_to_ptr.vmem [resolvable:$true] %s915_s17 }
 0x6fb   :  { %627 = vrot.lane.b32.xlu2 %v623_v54, %s1105_s22 }
 0x74e   :  { %v669_v18 = vpop.xlane.xlu2 %668 }
 0x74f   :  { %1030 = vrcp.f32 %v669_v18  ;;  %v681_v62 = vand.u32 2147483648, %v669_v18  ;;  %v679_v21 = vand.u32 2147483647, %v669_v18  ;;  %vm675_vm4 = vweird.f32 %v669_v18 }
 0x751   :  { %v756_v19 = vpop.xlane.xlu1 %755  ;;  %v682_v31 = vor.u32 1.1754944e-38, %v681_v62  ;;  %vm680_vm7 = vcmp.eq.f32.partialorder %v679_v21, 8.507059e+37 }
 0x752   :  { %1032 = vrcp.f32 %v756_v19  ;;  %v768_v30 = vand.u32 2147483648, %v756_v19  ;;  %v766_v33 = vand.u32 2147483647, %v756_v19  ;;  %vm762_vm8 = vweird.f32 %v756_v19 }
 0x753   :  { %1034 = vrcp.f32 %v1106_v53 }
 0x754   :  { %v769_v17 = vor.u32 1.1754944e-38, %v768_v30  ;;  %vm767_vm10 = vcmp.eq.f32.partialorder %v766_v33, 8.507059e+37 }
 0x755   :  { %v1031_v20 = vpop.eup %1030 }
 0x756   :  { %v671_v22 = vmul.f32 %v1031_v20, %v669_v18  ;;  %v277_v23 = vpop.permute.xlu2 %276  ;;  %vm676_vm3 = vweird.f32 %v1031_v20 }
 0x757   :  { %280 = vst.msk [vmem:[#allocation2] sm:$0xff] %vm279_vm14, %v277_v23  ;;  %vm677_vm5 = vmor %vm675_vm4, %vm676_vm3 }
 0x758   :  { %v1033_v24 = vpop.eup %1032  ;;  %v672_v25 = vsub.f32 1.0, %v671_v22  ;;  %368 = vst.msk [vmem:[#allocation2] sm:$0xff] %vm367_vm15, %v365_v1 }
 0x759   :  { %v758_v26 = vmul.f32 %v1033_v24, %v756_v19  ;;  %456 = vst.msk [vmem:[#allocation2] sm:$0xff] %vm455_vm2, %v453_v16  ;;  %vm763_vm6 = vweird.f32 %v1033_v24  ;;  %v1035_v54 = vpop.eup %1034 }
 0x75a   :  { %v673_v27 = vmul.f32 %v1031_v20, %v672_v25  ;;  %vm764_vm9 = vmor %vm762_vm8, %vm763_vm6  ;;  %v853_v55 = vmul.f32 32.0, %v1035_v54  ;;  %v1001_v25 = vld [vmem:[%s1416_s7] ss:$0 sm:$0xff]  ;;  %s1108_s7 = smov 128  }
 0x75b   :  { %v759_v28 = vsub.f32 1.0, %v758_v26 }
 0x75c   :  { %v674_v29 = vadd.f32 %v1031_v20, %v673_v27  ;;  %v854_v58 = vsub.f32 1.0, %v853_v55 }
 0x75d   :  { %v760_v32 = vmul.f32 %v1033_v24, %v759_v28 }
 0x75e   :  { %v678_v35 = vsel %vm677_vm5, %v1031_v20, %v674_v29  ;;  %v628_v36 = vpop.permute.xlu2 %627  ;;  %v855_v59 = vmul.f32 %v1035_v54, %v854_v58 }
 0x75f   :  { %v683_v15 = vsel %vm680_vm7, %v682_v31, %v678_v35  ;;  %v761_v37 = vadd.f32 %v1033_v24, %v760_v32  ;;  %630 = vst.msk [vmem:[#allocation2 + $0x8] sm:$0xff] %vm279_vm14, %v628_v36 }
 0x760   :  { %v684_v38 = vmul.f32 %v1027_v10, %v683_v15  ;;  %v805_v45 = vld [vmem:[#allocation2] sm:$0xff]  ;;  %v856_v60 = vadd.f32 %v1035_v54, %v855_v59 }
 0x761   :  { %v765_v39 = vsel %vm764_vm9, %v1033_v24, %v761_v37  ;;  %v1000_v24 = vld [vmem:[%s1415_s6] ss:$0 sm:$0xff]  ;;  %s928_s6 = sshll.u32 %s1107_s13, 4  ;;  %s929_s6 = int_to_ptr.vmem [resolvable:$true] %s928_s6 }
 0x762   :  { %v770_v12 = vsel %vm767_vm10, %v769_v17, %v765_v39  ;;  %686 = vst.msk [vmem:[#allocation5 + $0x30] sm:$0xff] %vm111_vm1, %v684_v38 }
 0x763   :  { %v771_v34 = vmul.f32 %v1029_v13, %v770_v12 }
 0x765   :  { %773 = vst.msk [vmem:[#allocation5 + $0x38] sm:$0xff] %vm111_vm1, %v771_v34  ;;  %977 = vmatmul.msk.f32.vlgmr.msrb.gmra.mxu2 %vm111_vm1, %v771_v34 }
 0x766   :  { %936 = dma.vmem_to_hbm [thread:$0]  %s929_s6, 1024, %s931_s16, [#allocation6], %s1108_s7, %s1108_s7, %s1105_s22  }
 0x769   :  { %v688_v40 = vpop.permute.xlu1 %687 }
 0x76a   :  { %708 = vmatpush.msrb.mxu1 %v688_v40 }
 0x76b   :  { %974 = vmatmul.msk.f32.vlgmr.msrb.gmra.mxu1 %vm111_vm1, %v684_v38  ;;  %vm857_vm1 = vweird.f32 %v1035_v54 }
 0x76c   :  { %833 = vmatpush.msra.mxu1 %v810_v41 }
 0x76e   :  { %834 = vmatpush.msra.mxu1 %v809_v42 }
 0x770   :  { %835 = vmatpush.msra.mxu1 %v808_v43 }
 0x772   :  { %836 = vmatpush.msra.mxu1 %v807_v44 }
 0x773   :  { %978 = vmatmul.msk.f32.vlgmr.msra.gmra.mxu1 %vm43_vm0, %v805_v45 }
 0x7e8   :  { %v710_v46 = vpop.f32.mrf.mxu1  ;;  %v797_v47 = vpop.f32.mrf.mxu2 }
 0x7e9   :  { %801 = vrot.lane.b32.xlu0 %v797_v47, %s1104_s21  ;;  %714 = vrot.lane.b32.xlu1 %v710_v46, %s1103_s1 }
 0x7f0   :  { %v838_v49 = vpop.f32.mrf.mxu1 }
 0x7f1   :  { %v839_v50 = vadd.f32 %v999_v48, %v838_v49 }
 0x7f3   :  { %v844_v51 = vadd.f32 %v839_v50, %v1175_v4  ;;  %v858_v4 = vsel %vm857_vm1, %v1035_v54, %v856_v60 }
 0x7f5   :  { %v846_v52 = vsel %vm43_vm0, %v844_v51, 0.0 }
 0x7f6   :  { %847 = vadd.xlane.f32.xlu2 %v846_v52 }
 0x85b   :  { %v802_v56 = vpop.permute.xlu0 %801  ;;  %v715_v57 = vpop.permute.xlu1 %714 }
 0x85c   :  { %717 = vst.msk [vmem:[#allocation2 + $0x8] sm:$0xff] %vm367_vm15, %v715_v57 }
 0x85d   :  { %804 = vst.msk [vmem:[#allocation2 + $0x8] sm:$0xff] %vm455_vm2, %v802_v56 }
 0x864   :  { %v806_v61 = vld [vmem:[#allocation2 + $0x8] sm:$0xff] }
 0x865   :  { %979 = vmatmul.msk.f32.gmra.mxu1 %vm43_vm0, %v806_v61 }
 0x869   :  { %v848_v2 = vpop.xlane.xlu2 %847 }
 0x86a   :  { %v859_v3 = vmul.f32 %v858_v4, %v848_v2 }
 0x86c   :  { %v861_v8 = vsub.f32 %v844_v51, %v859_v3 }
 0x86e   :  { %v863_v6 = vmul.f32 %v861_v8, %v861_v8 }
 0x870   :  { %v865_v7 = vsel %vm43_vm0, %v863_v6, 0.0 }
 0x871   :  { %866 = vadd.xlane.f32.xlu0 %v865_v7 }
 0x8e2   :  { %v841_v0 = vpop.f32.mrf.mxu1 }
 0x8e3   :  { %v842_v9 = vadd.f32 %v999_v48, %v841_v0 }
 0x8e4   :  { %v867_v10 = vpop.xlane.xlu0 %866 }
 0x8e5   :  { %v871_v11 = vmul.f32 %v867_v10, %v858_v4  ;;  %v845_v13 = vadd.f32 %v842_v9, %v1182_v5 }
 0x8e7   :  { %v873_v14 = vadd.f32 1e-05, %v871_v11  ;;  %v849_v63 = vsel %vm43_vm0, %v845_v13, 0.0 }
 0x8e8   :  { %850 = vadd.xlane.f32.xlu1 %v849_v63 }
 0x8e9   :  { %1036 = vrsqrt.f32 %v873_v14  ;;  %vm881_vm12 = vweird.f32 %v873_v14 }
 0x8ef   :  { %v1037_v1 = vpop.eup %1036 }
 0x8f0   :  { %v876_v18 = vmul.f32 %v1037_v1, %v873_v14  ;;  %vm882_vm11 = vweird.f32 %v1037_v1 }
 0x8f1   :  { %vm883_vm13 = vmor %vm881_vm12, %vm882_vm11 }
 0x8f2   :  { %v877_v19 = vmul.f32 %v1037_v1, %v876_v18 }
 0x8f4   :  { %v878_v20 = vmul.f32 0.5, %v877_v19 }
 0x8f6   :  { %v879_v22 = vsub.f32 1.5, %v878_v20 }
 0x8f8   :  { %v880_v23 = vmul.f32 %v1037_v1, %v879_v22 }
 0x8fa   :  { %v884_v16 = vsel %vm883_vm13, %v1037_v1, %v880_v23 }
 0x8fb   :  { %v895_v5 = vmul.f32 %v884_v16, %v861_v8 }
 0x8fd   :  { %v901_v62 = vmul.f32 %v1000_v24, %v895_v5 }
 0x8ff   :  { %v907_v26 = vadd.f32 %v1001_v25, %v901_v62 }
 0x901   :  { %909 = vst.msk [vmem:[#allocation3] sm:$0xff] %vm43_vm0, %v907_v26 }
 0x95b   :  { %v851_v27 = vpop.xlane.xlu1 %850 }
 0x95c   :  { %v860_v21 = vmul.f32 %v858_v4, %v851_v27 }
 0x95e   :  { %v862_v28 = vsub.f32 %v845_v13, %v860_v21 }
 0x960   :  { %v864_v29 = vmul.f32 %v862_v28, %v862_v28 }
 0x962   :  { %v868_v30 = vsel %vm43_vm0, %v864_v29, 0.0 }
 0x963   :  { %869 = vadd.xlane.f32.xlu2 %v868_v30 }
 0x9d6   :  { %v870_v31 = vpop.xlane.xlu2 %869 }
 0x9d7   :  { %v872_v32 = vmul.f32 %v870_v31, %v858_v4 }
 0x9d9   :  { %v874_v33 = vadd.f32 1e-05, %v872_v32 }
 0x9db   :  { %1038 = vrsqrt.f32 %v874_v33  ;;  %vm891_vm15 = vweird.f32 %v874_v33 }
 0x9e1   :  { %v1039_v35 = vpop.eup %1038 }
 0x9e2   :  { %v886_v36 = vmul.f32 %v1039_v35, %v874_v33  ;;  %vm892_vm14 = vweird.f32 %v1039_v35 }
 0x9e3   :  { %vm893_vm2 = vmor %vm891_vm15, %vm892_vm14 }
 0x9e4   :  { %v887_v15 = vmul.f32 %v1039_v35, %v886_v36 }
 0x9e6   :  { %v888_v37 = vmul.f32 0.5, %v887_v15 }
 0x9e8   :  { %v889_v17 = vsub.f32 1.5, %v888_v37 }
 0x9ea   :  { %v890_v38 = vmul.f32 %v1039_v35, %v889_v17 }
 0x9ec   :  { %v894_v39 = vsel %vm893_vm2, %v1039_v35, %v890_v38 }
 0x9ed   :  { %v896_v12 = vmul.f32 %v894_v39, %v862_v28 }
 0x9ef   :  { %v902_v34 = vmul.f32 %v1000_v24, %v896_v12 }
 0x9f1   :  { %v908_v40 = vadd.f32 %v1001_v25, %v902_v34 }
 0x9f3   :  { %910 = vst.msk [vmem:[#allocation3 + $0x8] sm:$0xff] %vm43_vm0, %v908_v40 }
 0x9f4   :  { %923 = dma.vmem_to_hbm [thread:$0]  %s916_s17, 256, %s918_s20, [#allocation4], %s1108_s7, %s1108_s7, %s1105_s22  }
 0x9f5   :  { %1088 = dma.done.wait [#allocation4], 256  }
 0x9f6   :  { %1089 = vsyncadd [#allocation4], 4294967040 }
 0x9f7   :  { %1090 = dma.done.wait [#allocation6], 1024  }
 0x9f8   :  { %1091 = vsyncadd [#allocation6], 4294966272 }
 0x9f9   :  { %945 = vsyncpa [#allocation4], 1 }
 0x9fa   :  { %946 = vsyncpa [#allocation6], 1 }

</bundles_post_ra>
